<compile_context>
chip_gen: v7x
topology: tpu7x:2x2x1
jax: 0.10.0
libtpu: 0.0.40
codegen_flags: <defaults>
</compile_context>

<pallas_src>
import jax
import jax.numpy as jnp
from jax.experimental import pallas as pl
from jax.experimental.pallas import tpu as pltpu

_DEFAULT_VMEM_BUDGET = 8 * 1024 * 1024  # total VMEM use incl. double buffering


def _pick_tile(extent, bytes_per_unit, quantum, budget_bytes):
    """Largest `quantum`-multiple tile along one axis whose double-buffered
    in+out footprint fits `budget_bytes`; returns the full extent if it fits
    (single grid step, per-step overhead ~0.35us avoided)."""
    per_step = max(budget_bytes // 2, 1)       # /2: Pallas double-buffers
    units = per_step // max(bytes_per_unit, 1)
    tile = (units // quantum) * quantum
    if tile <= 0:
        tile = quantum                          # degenerate fallback
    return extent if tile >= extent else tile


def _make_pad_width_kernel(c, tile_h, w, pad, fill, dtype):
    """h > w: pad the last (lane) dim by `pad` columns on each side."""

    def kernel(x_ref, o_ref):
        # Each output element written exactly once: left strip, interior,
        # right strip (no fill-then-overwrite of the interior).
        o_ref[:, :, pl.ds(0, pad)] = jnp.full((c, tile_h, pad), fill, dtype)
        o_ref[:, :, pl.ds(pad, w)] = x_ref[...]
        o_ref[:, :, pl.ds(pad + w, pad)] = jnp.full((c, tile_h, pad), fill, dtype)

    return kernel


def _make_pad_height_kernel(c, h, tile_w, pad, fill, dtype):
    """w > h: pad the row (sublane) dim by `pad` rows on each side."""

    def kernel(x_ref, o_ref):
        o_ref[:, pl.ds(0, pad), :] = jnp.full((c, pad, tile_w), fill, dtype)
        o_ref[:, pl.ds(pad, h), :] = x_ref[...]
        o_ref[:, pl.ds(pad + h, pad), :] = jnp.full((c, pad, tile_w), fill, dtype)

    return kernel


def _pad_to_square_chw(image, fill, vmem_budget_bytes):
    c, h, w = image.shape
    itemsize = image.dtype.itemsize

    if h > w:
        # Pad width.  Tile over the unpadded row axis (multiples of 8 rows).
        pad = (h - w) // 2
        out_w = w + 2 * pad
        bytes_per_row = c * (w + out_w) * itemsize
        tile_h = _pick_tile(h, bytes_per_row, 8, vmem_budget_bytes)
        kernel = _make_pad_width_kernel(c, tile_h, w, pad, fill, image.dtype)
        return pl.pallas_call(
            kernel,
            out_shape=jax.ShapeDtypeStruct((c, h, out_w), image.dtype),
            grid=(pl.cdiv(h, tile_h),),
            in_specs=[pl.BlockSpec((c, tile_h, w), lambda i: (0, i, 0))],
            out_specs=pl.BlockSpec((c, tile_h, out_w), lambda i: (0, i, 0)),
            compiler_params=pltpu.CompilerParams(
                dimension_semantics=("parallel",)),
        )(image)

    # w > h: pad height.  Tile over the unpadded column axis (128-lane quanta).
    pad = (w - h) // 2
    out_h = h + 2 * pad
    bytes_per_col = c * (h + out_h) * itemsize
    tile_w = _pick_tile(w, bytes_per_col, 128, vmem_budget_bytes)
    kernel = _make_pad_height_kernel(c, h, tile_w, pad, fill, image.dtype)
    return pl.pallas_call(
        kernel,
        out_shape=jax.ShapeDtypeStruct((c, out_h, w), image.dtype),
        grid=(pl.cdiv(w, tile_w),),
        in_specs=[pl.BlockSpec((c, h, tile_w), lambda j: (0, 0, j))],
        out_specs=pl.BlockSpec((c, out_h, tile_w), lambda j: (0, 0, j)),
        compiler_params=pltpu.CompilerParams(
            dimension_semantics=("parallel",)),
    )(image)


def pad_to_square(image, fill=0, padding_mode="constant",
                  vmem_budget_bytes=_DEFAULT_VMEM_BUDGET):
    """Pallas TPU equivalent of PadToSquare.forward.

    Accepts (C, H, W) like the reference module, or (N, C, H, W); a batch is
    folded into the channel dim (identical per-plane padding) so a single
    pallas_call amortizes launch overhead over the whole batch.
    """
    if padding_mode != "constant":
        # TODO(synk): reflect/replicate padding modes are not implemented
        # (the module default is 'constant').
        raise NotImplementedError("only padding_mode='constant' is supported")

    batched = image.ndim == 4
    if batched:
        n, c, h, w = image.shape
        image = image.reshape(n * c, h, w)     # leading-dim reshape: free

    _, h, w = image.shape
    if h == w:
        out = image                            # module returns input unchanged
    else:
        out = _pad_to_square_chw(image, fill, vmem_budget_bytes)

    if batched:
        out = out.reshape(n, c, *out.shape[1:])
    return out


# ---------------------------------------------------------------------------
if __name__ == "__main__":
    key = jax.random.PRNGKey(0)
    k1, k2, k3, k4, k5, k6 = jax.random.split(key, 6)

    # Case 1: landscape (w > h) -> pad height top/bottom.
    img_wide = jax.random.uniform(k1, (3, 16, 24), minval=0.0, maxval=255.0,
                                  dtype=jnp.float32)
    out_wide = pad_to_square(img_wide)
    jax.block_until_ready(out_wide)
    assert out_wide.shape == (3, 24, 24)
    assert bool(jnp.array_equal(out_wide, jnp.pad(img_wide, ((0, 0), (4, 4), (0, 0)))))

    # Case 2: portrait (h > w) -> pad width left/right.
    img_tall = jax.random.uniform(k2, (3, 24, 16), minval=0.0, maxval=255.0,
                                  dtype=jnp.float32)
    out_tall = pad_to_square(img_tall)
    jax.block_until_ready(out_tall)
    assert out_tall.shape == (3, 24, 24)
    assert bool(jnp.array_equal(out_tall, jnp.pad(img_tall, ((0, 0), (0, 0), (4, 4)))))

    # Case 3: already square -> returned unchanged (module semantics).
    img_sq = jax.random.uniform(k3, (3, 16, 16), minval=0.0, maxval=255.0,
                                dtype=jnp.float32)
    out_sq = pad_to_square(img_sq)
    jax.block_until_ready(out_sq)
    assert out_sq.shape == (3, 16, 16)
    assert bool(jnp.array_equal(out_sq, img_sq))

    # Case 4: wide image with a small VMEM budget -> multi-step column-tiled
    # grid (tile_w=128, 3 steps, partial last block).
    img_big_wide = jax.random.uniform(k4, (3, 96, 320), minval=0.0,
                                      maxval=255.0, dtype=jnp.float32)
    out_big_wide = pad_to_square(img_big_wide, vmem_budget_bytes=2 * 1024 * 1024)
    jax.block_until_ready(out_big_wide)
    assert out_big_wide.shape == (3, 320, 320)
    assert bool(jnp.array_equal(out_big_wide,
                                jnp.pad(img_big_wide, ((0, 0), (112, 112), (0, 0)))))

    # Case 5: tall image with a small VMEM budget -> multi-step row-tiled
    # grid (tile_h=96, 2 steps, partial last block).
    img_big_tall = jax.random.uniform(k5, (3, 160, 64), minval=0.0,
                                      maxval=255.0, dtype=jnp.float32)
    out_big_tall = pad_to_square(img_big_tall, vmem_budget_bytes=512 * 1024)
    jax.block_until_ready(out_big_tall)
    assert out_big_tall.shape == (3, 160, 160)
    assert bool(jnp.array_equal(out_big_tall,
                                jnp.pad(img_big_tall, ((0, 0), (0, 0), (48, 48)))))

    # Case 6: batched (N, C, H, W) input -> one pallas_call over the batch.
    imgs = jax.random.uniform(k6, (2, 3, 16, 24), minval=0.0, maxval=255.0,
                              dtype=jnp.float32)
    out_batch = pad_to_square(imgs)
    jax.block_until_ready(out_batch)
    assert out_batch.shape == (2, 3, 24, 24)
    assert bool(jnp.array_equal(out_batch,
                                jnp.pad(imgs, ((0, 0), (0, 0), (4, 4), (0, 0)))))

    print("KERNEL_OK")
</pallas_src>

<mosaic_0001>
module attributes {stable_mosaic.version = 11 : i64} {
  func.func @kernel(%arg0: i32, %arg1: memref<3x16x24xf32, #tpu.memory_space<vmem>>, %arg2: memref<3x24x24xf32, #tpu.memory_space<vmem>>) attributes {dimension_semantics = [#tpu.dimension_semantics<parallel>], iteration_bounds = array<i64: 1>, scalar_prefetch = 0 : i64, scratch_operands = 0 : i64, tpu.core_type = #tpu.core_type<tc>, window_params = [{transform_indices = @transform_0, window_bounds = array<i64: 3, 16, 24>}, {transform_indices = @transform_1, window_bounds = array<i64: 3, 24, 24>}]} {
    %cst = arith.constant 0.000000e+00 : f32
    %0 = vector.broadcast %cst : f32 to vector<3x4x24xf32>
    %c0 = arith.constant 0 : index
    %c0_0 = arith.constant 0 : index
    %c0_1 = arith.constant 0 : index
    %1 = vector.load %arg2[%c0, %c0_0, %c0_1] : memref<3x24x24xf32, #tpu.memory_space<vmem>>, vector<3x4x24xf32>
    tpu.vector_store %arg2[%c0, %c0_0, %c0_1], %0 {strides = array<i32>} : memref<3x24x24xf32, #tpu.memory_space<vmem>>, vector<3x4x24xf32>,
    %c0_2 = arith.constant 0 : index
    %c0_3 = arith.constant 0 : index
    %c0_4 = arith.constant 0 : index
    %2 = vector.load %arg1[%c0_2, %c0_3, %c0_4] : memref<3x16x24xf32, #tpu.memory_space<vmem>>, vector<3x16x24xf32>
    %c0_5 = arith.constant 0 : index
    %c4 = arith.constant 4 : index
    %c0_6 = arith.constant 0 : index
    %3 = vector.load %arg2[%c0_5, %c4, %c0_6] : memref<3x24x24xf32, #tpu.memory_space<vmem>>, vector<3x16x24xf32>
    tpu.vector_store %arg2[%c0_5, %c4, %c0_6], %2 {strides = array<i32>} : memref<3x24x24xf32, #tpu.memory_space<vmem>>, vector<3x16x24xf32>,
    %cst_7 = arith.constant 0.000000e+00 : f32
    %4 = vector.broadcast %cst_7 : f32 to vector<3x4x24xf32>
    %c0_8 = arith.constant 0 : index
    %c20 = arith.constant 20 : index
    %c0_9 = arith.constant 0 : index
    %5 = vector.load %arg2[%c0_8, %c20, %c0_9] : memref<3x24x24xf32, #tpu.memory_space<vmem>>, vector<3x4x24xf32>
    tpu.vector_store %arg2[%c0_8, %c20, %c0_9], %4 {strides = array<i32>} : memref<3x24x24xf32, #tpu.memory_space<vmem>>, vector<3x4x24xf32>,
    return
  }
  func.func @transform_0(%arg0: i32) -> (i32, i32, i32) {
    %c0_i32 = arith.constant 0 : i32
    %c0_i32_0 = arith.constant 0 : i32
    %c0_i32_1 = arith.constant 0 : i32
    return %c0_i32, %c0_i32_0, %arg0 : i32, i32, i32
  }
  func.func @transform_1(%arg0: i32) -> (i32, i32, i32) {
    %c0_i32 = arith.constant 0 : i32
    %c0_i32_0 = arith.constant 0 : i32
    %c0_i32_1 = arith.constant 0 : i32
    return %c0_i32, %c0_i32_0, %arg0 : i32, i32, i32
  }
}

</mosaic_0001>

<bundles_post_ra>
// kernel: tpu_custom_call.1
= control target key start
LH: loop header
LB: loop body
LE: loop exit
PB: predicated region body
PF: predicated region fallthrough
CT: control target
= control target key end

     0   :  { %6 = vsyncpa [#allocation3], 0  ;;  %s158_s0 = inlined_call_operand.hbm [shape: f32[3,16,24], index: 0, kind: input, shape index: {}]   ;;  %s159_s1 = inlined_call_operand.hbm [shape: f32[3,24,24], index: 1, kind: output, shape index: {}]  }
   0x1   :  { %7 = vsyncpa [#allocation4], 0  ;;  %s113_s6 = smov [#allocation2]   ;;  %s65_s10 = scalar_lea.hbm %s158_s0, 768 }
   0x2   :  { %s13_s7 = sshll.u32 %s113_s6, 4  ;;  %p66_p0 = scmp.ne.s32.totalorder %s158_s0, %s65_s10  ;;  %s14_s7 = int_to_ptr.vmem [resolvable:$true] %s13_s7 }
   0x3   :  { %p69_p1 = scmp.lt.u32.totalorder %s65_s10, %s158_s0 }
   0x5   :  { %p71_p2 = pnand %p69_p1, %p66_p0 }
   0x7   :  { %74 = shalt.err (!%p71_p2)
}
   0x8   :  { %s75_s15 = scalar_lea.vmem %s14_s7, 768  ;;  %p80_p4 = scmp.lt.s32.totalorder %s14_s7, %s14_s7 }
   0x9   :  { %p76_p3 = scmp.ne.s32.totalorder %s14_s7, %s75_s15  ;;  %p81_p5 = scmp.lt.s32.totalorder %s75_s15, %s75_s15 }
   0xb   :  { %p82_p6 = por %p81_p5, %p80_p4 }
   0xd   :  { %p83_p7 = pnand %p82_p6, %p76_p3 }
   0xf   :  { %86 = shalt.err (!%p83_p7)
}
  0x10   :  { %s114_s16 = smov 128   ;;  %s115_s17 = smov 8  }
  0x11   :  { %19 = dma.hbm_to_vmem [thread:$0]  %s158_s0, 768, %s14_s7, [#allocation3], %s114_s16, %s114_s16, %s115_s17  }
  0x12   :  { %109 = dma.done.wait [#allocation3], 768  }
  0x13   :  { %110 = vsyncadd [#allocation3], 4294966528  ;;  %vm23_vm0 = vcmask 191488   ;;  %v116_v0 = vmov 0.0   ;;  %s117_s20 = smov [#allocation5]   ;;  %vm33_vm1 = vcmask 195584  }
  0x14   :  { %24 = vst.msk [vmem:[#allocation5] sm:$0xf] %vm23_vm0, %v116_v0  ;;  %25 = vst.msk [vmem:[#allocation5 + $0x18] sm:$0xf] %vm23_vm0, %v116_v0  ;;  %s48_s21 = sshll.u32 %s117_s20, 4  ;;  %v27_v1 = vld [vmem:[#allocation2] sm:$0xff]  ;;  %s49_s21 = int_to_ptr.vmem [resolvable:$true] %s48_s21 }
  0x15   :  { %26 = vst.msk [vmem:[#allocation5 + $0x30] sm:$0xf] %vm23_vm0, %v116_v0  ;;  %40 = vst.msk [vmem:[#allocation5 + $0x14] sm:$0xf] %vm23_vm0, %v116_v0  ;;  %v28_v2 = vld [vmem:[#allocation2 + $0x8] sm:$0xff]  ;;  %v29_v3 = vld [vmem:[#allocation2 + $0x10] sm:$0xff]  ;;  %p92_p9 = scmp.lt.s32.totalorder %s49_s21, %s49_s21 }
  0x16   :  { %41 = vst.msk [vmem:[#allocation5 + $0x2c] sm:$0xf] %vm23_vm0, %v116_v0  ;;  %42 = vst.msk [vmem:[#allocation5 + $0x44] sm:$0xf] %vm23_vm0, %v116_v0  ;;  %v30_v4 = vld [vmem:[#allocation2 + $0x18] sm:$0xff]  ;;  %v31_v5 = vld [vmem:[#allocation2 + $0x20] sm:$0xff] }
  0x17   :  { %34 = vst.msk [vmem:[#allocation5 + $0x4] sm:$0xff] %vm33_vm1, %v27_v1  ;;  %35 = vst.msk [vmem:[#allocation5 + $0xc] sm:$0xff] %vm33_vm1, %v28_v2  ;;  %v32_v6 = vld [vmem:[#allocation2 + $0x28] sm:$0xff]  ;;  %s87_s0 = scalar_lea.vmem %s49_s21, 1152 }
  0x18   :  { %36 = vst.msk [vmem:[#allocation5 + $0x1c] sm:$0xff] %vm33_vm1, %v29_v3  ;;  %37 = vst.msk [vmem:[#allocation5 + $0x24] sm:$0xff] %vm33_vm1, %v30_v4  ;;  %p88_p8 = scmp.ne.s32.totalorder %s49_s21, %s87_s0  ;;  %p93_p10 = scmp.lt.s32.totalorder %s87_s0, %s87_s0 }
  0x19   :  { %38 = vst.msk [vmem:[#allocation5 + $0x34] sm:$0xff] %vm33_vm1, %v31_v5  ;;  %39 = vst.msk [vmem:[#allocation5 + $0x3c] sm:$0xff] %vm33_vm1, %v32_v6 }
  0x1a   :  { %p94_p11 = por %p93_p10, %p92_p9 }
  0x1c   :  { %p95_p12 = pnand %p94_p11, %p88_p8 }
  0x1e   :  { %98 = shalt.err (!%p95_p12)
}
  0x1f   :  { %s99_s24 = scalar_lea.hbm %s159_s1, 1152 }
  0x20   :  { %p100_p13 = scmp.ne.s32.totalorder %s159_s1, %s99_s24  ;;  %p103_p0 = scmp.lt.u32.totalorder %s99_s24, %s159_s1 }
  0x22   :  { %p105_p1 = pnand %p103_p0, %p100_p13 }
  0x24   :  { %108 = shalt.err (!%p105_p1)
}
  0x25   :  { %54 = dma.vmem_to_hbm [thread:$0]  %s49_s21, 1152, %s159_s1, [#allocation4], %s114_s16, %s114_s16, %s115_s17  }
  0x26   :  { %111 = dma.done.wait [#allocation4], 1152  }
  0x27   :  { %112 = vsyncadd [#allocation4], 4294966144 }
  0x28   :  { %58 = vsyncpa [#allocation3], 1 }
  0x29   :  { %59 = vsyncpa [#allocation4], 1 }

</bundles_post_ra>
